<compile_context>
chip_gen: v6e
topology: v6e:2x2x1
jax: 0.10.0
libtpu: 0.0.40
codegen_flags: <defaults>
</compile_context>

<pallas_src>
import math

import jax
import jax.numpy as jnp
from jax import lax
from jax.experimental import pallas as pl
from jax.experimental.pallas import tpu as pltpu


# ----------------------------- Pallas kernel ------------------------------- #

def _make_conv_tap_kernel(num_taps, tap_loader, has_bias):
    """Builds the kernel body.

    Per grid step (one batch element):
        out[co, l] = sum_k  w_taps[k, co, :] @ x_tap_k[:, l]   (+ bias[co])
    with bf16 MXU matmuls accumulated in f32 and a lane-dense (Cout, L_out) store.
    """

    def _compute(x_ref, w_ref, b_ref, o_ref):
        acc = None
        for k in range(num_taps):                     # K is small & static
            xk = tap_loader(x_ref, k)                 # (Cin, L_out), compute dtype
            part = jnp.dot(w_ref[k], xk, preferred_element_type=jnp.float32)
            acc = part if acc is None else acc + part
        if b_ref is not None:
            acc = acc + b_ref[...]                    # (Cout, 1) broadcast over lanes
        o_ref[0] = acc.astype(o_ref.dtype)

    if has_bias:
        def kernel(x_ref, w_ref, b_ref, o_ref):
            _compute(x_ref, w_ref, b_ref, o_ref)
    else:
        def kernel(x_ref, w_ref, o_ref):              # no dead zero-bias add
            _compute(x_ref, w_ref, None, o_ref)
    return kernel


def _conv1d_pallas(x_blocks, w_taps, bias_col, *, tap_loader, l_out, out_dtype):
    """Grid over batch; one full lane-dense (Cout, L_out) row per grid step."""
    n = x_blocks.shape[0]
    num_taps, cout, cin = w_taps.shape

    x_block_shape = (1,) + x_blocks.shape[1:]
    x_zeros = (0,) * (len(x_block_shape) - 1)

    in_specs = [
        pl.BlockSpec(x_block_shape, lambda b: (b,) + x_zeros),
        # Weight / bias blocks are constant across the grid -> loaded once, resident.
        pl.BlockSpec((num_taps, cout, cin), lambda b: (0, 0, 0)),
    ]
    args = [x_blocks, w_taps]
    if bias_col is not None:
        in_specs.append(pl.BlockSpec((cout, 1), lambda b: (0, 0)))
        args.append(bias_col)

    kernel = _make_conv_tap_kernel(num_taps, tap_loader, bias_col is not None)

    return pl.pallas_call(
        kernel,
        out_shape=jax.ShapeDtypeStruct((n, cout, l_out), out_dtype),
        grid_spec=pltpu.PrefetchScalarGridSpec(
            num_scalar_prefetch=0,
            grid=(n,),
            in_specs=in_specs,
            out_specs=pl.BlockSpec((1, cout, l_out), lambda b: (b, 0, 0)),
        ),
        compiler_params=pltpu.CompilerParams(
            dimension_semantics=("parallel",),
            vmem_limit_bytes=48 * 1024 * 1024,   # above 32MiB scoped default, under v7x 64MiB
        ),
    )(*args)


# ------------------------------ Module port -------------------------------- #

class Conv1DPallas:
    """JAX/Pallas port of ConvNDBase with nr_dims=1, __transposed__=False."""

    def __init__(self, in_channels, out_channels, kernel_size, stride=1,
                 padding_mode='default', padding=0, border_mode='zero',
                 dilation=1, groups=1, bias=True, key=None,
                 compute_dtype=jnp.bfloat16):
        assert padding_mode in ('default', 'valid', 'same')
        assert border_mode in ('zero', 'reflect', 'replicate')
        assert groups == 1  # TODO(synk): grouped conv not implemented in this kernel.
        self.in_channels = int(in_channels)
        self.out_channels = int(out_channels)
        self.kernel_size = int(kernel_size)
        self.stride = int(stride)
        self.dilation = int(dilation)
        self.padding_mode = padding_mode
        self.padding = int(padding)
        self.border_mode = border_mode
        self.has_bias = bool(bias)
        self.compute_dtype = compute_dtype

        # Deterministic init (PyTorch-style uniform bound), not a checkpoint load.
        if key is None:
            key = jax.random.PRNGKey(0)
        kw, kb = jax.random.split(key)
        fan_in = in_channels * self.kernel_size
        bound = 1.0 / math.sqrt(fan_in)
        self.weight = jax.random.uniform(
            kw, (out_channels, in_channels, self.kernel_size),
            minval=-bound, maxval=bound, dtype=jnp.float32)
        self.bias = (jax.random.uniform(kb, (out_channels,), minval=-bound,
                                        maxval=bound, dtype=jnp.float32)
                     if bias else None)

        # Precomputed kernel-side parameter layouts (once, not per call):
        #   w_taps[k, co, ci] = weight[co, ci, k]   (compute dtype for the MXU)
        #   bias_col          = bias[:, None]       (f32, added after f32 accumulation)
        self._w_taps = jnp.transpose(self.weight, (2, 0, 1)).astype(compute_dtype)
        self._bias_col = self.bias.reshape(out_channels, 1) if bias else None

    # --- padding logic, mirrors ConvNDBase._compute_padding / _forward_padding ---
    def _compute_padding(self):
        if self.padding_mode == 'default':
            return self.padding
        if self.padding_mode == 'valid':
            return 0
        assert self.kernel_size % 2 == 1          # 'same'
        return self.kernel_size // 2

    def _forward_padding(self, x):
        pad = self._compute_padding()
        if pad == 0:
            return x
        mode = {'zero': 'constant', 'reflect': 'reflect',
                'replicate': 'edge'}[self.border_mode]
        return jnp.pad(x, ((0, 0), (0, 0), (pad, pad)), mode=mode)

    # --- conv forward ---
    def __call__(self, x):
        # x: (N, C_in, L) in NCW, like torch.
        out_dtype = x.dtype
        x = self._forward_padding(x)              # (N, Cin, Lp)
        n, cin, lp = x.shape
        assert cin == self.in_channels
        k, s, d = self.kernel_size, self.stride, self.dilation
        l_out = (lp - d * (k - 1) - 1) // s + 1
        assert l_out > 0

        xc = x.astype(self.compute_dtype)         # halve DMA bytes; f32 accumulation in-kernel

        if s == 1:
            # Fully fused path: kernel reads K statically shifted windows of the
            # (Cin, Lp) row directly from VMEM -- no im2col / x duplication in HBM.
            x_blocks = xc                          # (N, Cin, Lp)

            def tap_loader(x_ref, kk, _d=d, _l=l_out):
                return x_ref[0, :, pl.ds(kk * _d, _l)]
        else:
            # stride > 1: one cheap strided lax slice per tap (no gather indices),
            # stacked on a tap axis so the kernel reads contiguous (Cin, L_out) blocks.
            taps = [lax.slice(xc, (0, 0, kk * d),
                              (n, cin, kk * d + (l_out - 1) * s + 1),
                              (1, 1, s))
                    for kk in range(k)]
            x_blocks = jnp.stack(taps, axis=1)     # (N, K, Cin, L_out)

            def tap_loader(x_ref, kk):
                return x_ref[0, kk]

        # TODO(synk): for very long rows (Cin*Lp beyond VMEM) add an L_out tile axis
        # with halo DMAs; the current design keeps one full row resident per grid step.
        return _conv1d_pallas(x_blocks, self._w_taps, self._bias_col,
                              tap_loader=tap_loader, l_out=l_out,
                              out_dtype=out_dtype)


# --------------------------------- Demo ------------------------------------ #

if __name__ == "__main__":
    key = jax.random.PRNGKey(0)
    kx, kp1, kp2 = jax.random.split(key, 3)

    n, cin, l = 2, 4, 16
    cout, k = 8, 3
    x = jax.random.normal(kx, (n, cin, l), dtype=jnp.float32)

    # --- Test 1: 'same' padding, zero border, stride 1, bias (fused tap path). ---
    conv = Conv1DPallas(cin, cout, k, stride=1, padding_mode='same',
                        border_mode='zero', dilation=1, bias=True, key=kp1)
    y = jax.block_until_ready(conv(x))
    assert y.shape == (n, cout, l), y.shape

    # Reference: f32 conv on bf16-rounded inputs (kernel uses bf16 MXU inputs with
    # f32 accumulation, so only summation order differs from this reference).
    xq = conv._forward_padding(x).astype(jnp.bfloat16).astype(jnp.float32)
    wq = conv.weight.astype(jnp.bfloat16).astype(jnp.float32)
    y_ref = lax.conv_general_dilated(
        xq, wq, window_strides=(1,), padding='VALID', rhs_dilation=(1,),
        dimension_numbers=('NCH', 'OIH', 'NCH')) + conv.bias[None, :, None]
    assert jnp.allclose(y, y_ref, atol=1e-3, rtol=1e-3), \
        float(jnp.abs(y - y_ref).max())

    # --- Test 2: explicit padding, replicate border, stride 2, dilation 2, no bias. ---
    conv2 = Conv1DPallas(cin, 6, k, stride=2, padding_mode='default', padding=2,
                         border_mode='replicate', dilation=2, bias=False, key=kp2)
    y2 = jax.block_until_ready(conv2(x))
    xq2 = conv2._forward_padding(x).astype(jnp.bfloat16).astype(jnp.float32)
    wq2 = conv2.weight.astype(jnp.bfloat16).astype(jnp.float32)
    y_ref2 = lax.conv_general_dilated(
        xq2, wq2, window_strides=(2,), padding='VALID', rhs_dilation=(2,),
        dimension_numbers=('NCH', 'OIH', 'NCH'))
    assert y2.shape == y_ref2.shape, (y2.shape, y_ref2.shape)
    assert jnp.allclose(y2, y_ref2, atol=1e-3, rtol=1e-3), \
        float(jnp.abs(y2 - y_ref2).max())

    print("KERNEL_OK")
</pallas_src>

<mosaic_0001>
module attributes {stable_mosaic.version = 11 : i64} {
  func.func @kernel(%arg0: i32, %arg1: memref<1x4x18xbf16, #tpu.memory_space<vmem>>, %arg2: memref<3x8x4xbf16, #tpu.memory_space<vmem>>, %arg3: memref<8x1xf32, #tpu.memory_space<vmem>>, %arg4: memref<1x8x16xf32, #tpu.memory_space<vmem>>) attributes {dimension_semantics = [#tpu.dimension_semantics<parallel>], iteration_bounds = array<i64: 2>, scalar_prefetch = 0 : i64, scratch_operands = 0 : i64, tpu.core_type = #tpu.core_type<tc>, window_params = [{transform_indices = @transform_0, window_bounds = array<i64: 1, 4, 18>}, {pipeline_mode = #tpu.pipeline_mode<synchronous>, transform_indices = @transform_1, window_bounds = array<i64: 3, 8, 4>}, {pipeline_mode = #tpu.pipeline_mode<synchronous>, transform_indices = @transform_2, window_bounds = array<i64: 8, 1>}, {transform_indices = @transform_3, window_bounds = array<i64: 1, 8, 16>}]} {
    %c0 = arith.constant 0 : index
    %c0_0 = arith.constant 0 : index
    %c0_1 = arith.constant 0 : index
    %0 = vector.load %arg1[%c0, %c0_0, %c0_1] : memref<1x4x18xbf16, #tpu.memory_space<vmem>>, vector<1x4x16xbf16>
    %1 = vector.shape_cast %0 : vector<1x4x16xbf16> to vector<4x16xbf16>
    %c0_2 = arith.constant 0 : index
    %c0_3 = arith.constant 0 : index
    %c0_4 = arith.constant 0 : index
    %2 = vector.load %arg2[%c0_2, %c0_3, %c0_4] : memref<3x8x4xbf16, #tpu.memory_space<vmem>>, vector<1x8x4xbf16>
    %3 = vector.shape_cast %2 : vector<1x8x4xbf16> to vector<8x4xbf16>
    %cst = arith.constant dense<0.000000e+00> : vector<8x16xf32>
    %4 = tpu.matmul %3, %1, %cst {dimension_numbers = #tpu.dot_dimension_numbers<[1], [0], [0], [1], [0, 0, 1, 1], [], []>} : vector<8x4xbf16>, vector<4x16xbf16>, vector<8x16xf32> -> vector<8x16xf32>
    %c0_5 = arith.constant 0 : index
    %c0_6 = arith.constant 0 : index
    %c1 = arith.constant 1 : index
    %5 = vector.load %arg1[%c0_5, %c0_6, %c1] : memref<1x4x18xbf16, #tpu.memory_space<vmem>>, vector<1x4x16xbf16>
    %6 = vector.shape_cast %5 : vector<1x4x16xbf16> to vector<4x16xbf16>
    %c1_7 = arith.constant 1 : index
    %c0_8 = arith.constant 0 : index
    %c0_9 = arith.constant 0 : index
    %7 = vector.load %arg2[%c1_7, %c0_8, %c0_9] : memref<3x8x4xbf16, #tpu.memory_space<vmem>>, vector<1x8x4xbf16>
    %8 = vector.shape_cast %7 : vector<1x8x4xbf16> to vector<8x4xbf16>
    %cst_10 = arith.constant dense<0.000000e+00> : vector<8x16xf32>
    %9 = tpu.matmul %8, %6, %cst_10 {dimension_numbers = #tpu.dot_dimension_numbers<[1], [0], [0], [1], [0, 0, 1, 1], [], []>} : vector<8x4xbf16>, vector<4x16xbf16>, vector<8x16xf32> -> vector<8x16xf32>
    %10 = arith.addf %4, %9 : vector<8x16xf32>
    %c0_11 = arith.constant 0 : index
    %c0_12 = arith.constant 0 : index
    %c2 = arith.constant 2 : index
    %11 = vector.load %arg1[%c0_11, %c0_12, %c2] : memref<1x4x18xbf16, #tpu.memory_space<vmem>>, vector<1x4x16xbf16>
    %12 = vector.shape_cast %11 : vector<1x4x16xbf16> to vector<4x16xbf16>
    %c2_13 = arith.constant 2 : index
    %c0_14 = arith.constant 0 : index
    %c0_15 = arith.constant 0 : index
    %13 = vector.load %arg2[%c2_13, %c0_14, %c0_15] : memref<3x8x4xbf16, #tpu.memory_space<vmem>>, vector<1x8x4xbf16>
    %14 = vector.shape_cast %13 : vector<1x8x4xbf16> to vector<8x4xbf16>
    %cst_16 = arith.constant dense<0.000000e+00> : vector<8x16xf32>
    %15 = tpu.matmul %14, %12, %cst_16 {dimension_numbers = #tpu.dot_dimension_numbers<[1], [0], [0], [1], [0, 0, 1, 1], [], []>} : vector<8x4xbf16>, vector<4x16xbf16>, vector<8x16xf32> -> vector<8x16xf32>
    %16 = arith.addf %10, %15 : vector<8x16xf32>
    %c0_17 = arith.constant 0 : index
    %c0_18 = arith.constant 0 : index
    %17 = vector.load %arg3[%c0_17, %c0_18] : memref<8x1xf32, #tpu.memory_space<vmem>>, vector<8x1xf32>
    %18 = vector.broadcast %17 : vector<8x1xf32> to vector<8x16xf32>
    %19 = arith.addf %16, %18 : vector<8x16xf32>
    %c0_19 = arith.constant 0 : index
    %c0_20 = arith.constant 0 : index
    %c0_21 = arith.constant 0 : index
    %20 = vector.load %arg4[%c0_19, %c0_20, %c0_21] : memref<1x8x16xf32, #tpu.memory_space<vmem>>, vector<1x8x16xf32>
    %21 = vector.shape_cast %20 : vector<1x8x16xf32> to vector<8x16xf32>
    %22 = vector.shape_cast %19 : vector<8x16xf32> to vector<1x8x16xf32>
    tpu.vector_store %arg4[%c0_19, %c0_20, %c0_21], %22 {strides = array<i32>} : memref<1x8x16xf32, #tpu.memory_space<vmem>>, vector<1x8x16xf32>,
    return
  }
  func.func @transform_0(%arg0: i32) -> (i32, i32, i32) {
    %c0_i32 = arith.constant 0 : i32
    %c0_i32_0 = arith.constant 0 : i32
    %c0_i32_1 = arith.constant 0 : i32
    return %arg0, %c0_i32, %c0_i32_0 : i32, i32, i32
  }
  func.func @transform_1(%arg0: i32) -> (i32, i32, i32) {
    %c0_i32 = arith.constant 0 : i32
    %c0_i32_0 = arith.constant 0 : i32
    %c0_i32_1 = arith.constant 0 : i32
    %c0_i32_2 = arith.constant 0 : i32
    return %c0_i32, %c0_i32_0, %c0_i32_1 : i32, i32, i32
  }
  func.func @transform_2(%arg0: i32) -> (i32, i32) {
    %c0_i32 = arith.constant 0 : i32
    %c0_i32_0 = arith.constant 0 : i32
    %c0_i32_1 = arith.constant 0 : i32
    return %c0_i32, %c0_i32_0 : i32, i32
  }
  func.func @transform_3(%arg0: i32) -> (i32, i32, i32) {
    %c0_i32 = arith.constant 0 : i32
    %c0_i32_0 = arith.constant 0 : i32
    %c0_i32_1 = arith.constant 0 : i32
    return %arg0, %c0_i32, %c0_i32_0 : i32, i32, i32
  }
}

</mosaic_0001>

<bundles_post_ra>
// kernel: tpu_custom_call.1
= control target key start
LH: loop header
LB: loop body
LE: loop exit
PB: predicated region body
PF: predicated region fallthrough
CT: control target
= control target key end

     0   :  { %8 = vsyncpa [#allocation3], 0  ;;  %s713_s0 = inlined_call_operand.vmem [shape: bf16[2,4,18], index: 0, kind: input, shape index: {}]   ;;  %s714_s1 = inlined_call_operand.vmem [shape: bf16[3,8,4], index: 1, kind: input, shape index: {}]   ;;  %s715_s2 = inlined_call_operand.vmem [shape: f32[8,1], index: 2, kind: input, shape index: {}]   ;;  %s716_s3 = inlined_call_operand.hbm [shape: f32[2,8,16], index: 3, kind: output, shape index: {}]  }
   0x1   :  { %10 = vsyncpa [#allocation3 + $0x1], 0  ;;  %s593_s12 = smov 0   ;;  %s595_s13 = smov 0  }
   0x2   :  { %s597_s14 = smov 0   ;;  %s599_s15 = smov 0  }
   0x3 LB: > { %s614_s16 = sadd.s32 4294967295, %s564_s15   ;;  %s417_s17 = sadd.s32 4294967294, %s564_s15   ;;  %s564_s15 = sphi %s599_s15, %s722_s15   ;;  %s560_s14 = sphi %s597_s14, %s721_s14   ;;  %s556_s13 = sphi %s595_s13, %s720_s13   ;;  %s552_s12 = sphi %s593_s12, %s719_s12  }
   0x4   : > { %s618_s18 = sadd.s32 1, %s564_s15   ;;  %s91_s19 = sadd.s32 1, %s560_s14 }
   0x5   : > { %s88_s20 = ssub.s32 %s564_s15, %s618_s18  ;;  %p101_p0 = scmp.ne.s32.totalorder %s560_s14, %s556_s13 }
   0x6   : > { %p89_p1 = scmp.eq.s32.totalorder %s88_s20, 0  ;;  %p102_p2 = scmp.eq.s32.totalorder %s614_s16, 1 }
   0x7   : > { %p107_p3 = scmp.ne.s32.totalorder %s556_s13, %s552_s12  ;;  %p108_p4 = scmp.eq.s32.totalorder %s417_s17, 1 }
   0x8   : > { %s629_s21 = scalar_select %p89_p1, %s560_s14, %s91_s19  }
   0x9   : > { %p631_p5 = por %p102_p2, %p101_p0  ;;  %p635_p6 = por %p108_p4, %p107_p3 }
   0xa   : > { %p420_p7 = scmp.ge.s32.totalorder %s564_s15, 1  ;;  %p139_p8 = scmp.lt.s32.totalorder %s564_s15, 3 }
   0xc   : > { %p140_p9 = pnand %p420_p7, %p139_p8 }
   0xd   : > { %p162_p10 = scmp.lt.s32.totalorder (!%p140_p9), %s614_s16, 1  ;;  %s569_s6 = smov (!%p140_p9), 127  }
   0xe   : > { %143 = sbr.rel (%p140_p9) target bundleno = 366 (0x16e), region = 32  ;;  %s571_s7 = smov (!%p140_p9), 126  }
   0xf   : > { %s159_s17 = sand.u32 (!%p140_p9), 1, %s556_s13   ;;  %s430_s20 = sshll.u32 (!%p140_p9), %s614_s16, 7 }
  0x10   : > { %s421_s19 = sshll.u32 (!%p140_p9), %s159_s17, 3  ;;  %s572_s30 = smov (!%p140_p9), [#allocation2]  }
  0x11   : > { %s508_s4 = sshll.u32 (!%p140_p9), %s572_s30, 4  ;;  %s509_s4 = int_to_ptr.vmem [resolvable:$false] %s508_s4 }
  0x12   : > { %s510_s5 = scalar_lea.vmem (!%p140_p9), %s509_s4, 256 }
  0x13   : > { %v175_v0 = vlaneseq  ;;  %v566_v1 = vmov 1983009808   ;;  %v567_v3 = vmov 0.0   ;;  %s163_s24 = scalar_select %p162_p10, %s614_s16, 1  ;;  %vm568_vm0 = vmmov 0   ;;  %v335_v11 = vld [vmem:[%s715_s2] sm:$0xff] }
  0x14   : > { %v173_v2 = vunpack.c.l.s4 %v566_v1  ;;  %439 = vmatprep.subr.bf16.mxu0 %v567_v3  ;;  %445 = vmatprep.subr.bf16.mxu1 %v567_v3  ;;  %vm185_vm1 = vcmask 1041408   ;;  %vm181_vm2 = vcmask 31744   ;;  %v168_v10 = vld [vmem:[%s714_s1] sm:$0xf]  ;;  %v570_v12 = vmov 0   ;;  %s345_s16 = scalar_lea.sflag [#allocation3], %s159_s17 }
  0x15   : > { %v176_v4 = vshrl.u32 %v175_v0, 7  ;;  %441 = vmatprep.mubr.msk.bf16.mxu0 %vm568_vm0, %v567_v3  ;;  %447 = vmatprep.mubr.msk.bf16.mxu1 %vm568_vm0, %v567_v3  ;;  %s422_s25 = sshll.u32 %s163_s24, 1  ;;  %v423_v16 = vld [vmem:[%s714_s1 + $0x4] sm:$0xf]  ;;  %v426_v19 = vld [vmem:[%s714_s1 + $0x8] sm:$0xf] }
  0x16   : > { %v174_v5 = vunpack.c.0.s8 %v173_v2  ;;  %s165_s28 = scalar_lea.vmem %s713_s0, %s422_s25  ;;  %502 = vset.pattern.permute.xlu1 %v570_v12  ;;  %503 = vset.pattern.permute.xlu0 %v570_v12  ;;  %s161_s24 = scalar_lea.vmem [#allocation2], %s421_s19  ;;  %vm342_vm3 = vcmask 130048  }
  0x17   : > { %v167_v7 = vld [vmem:[%s165_s28] sm:$0x3]  ;;  %338 = vperm.xlu1 %502, %v335_v11   ;;  %s358_s25 = sshll.u32 %s161_s24, 4  ;;  %s674_s25 = int_to_ptr.vmem [resolvable:$true] %s358_s25 }
  0x18   : > { %v177_v6 = vsub.s32 %v174_v5, %v176_v4  ;;  %v233_v9 = vsel %vm185_vm1, %v167_v7, 0  ;;  %v427_v13 = vld.sshfl [vmem:[%s165_s28] sm:$0x3 pattern:$0x76325410]  ;;  %s672_s28 = scalar_lea.hbm %s716_s3, %s430_s20  ;;  %s504_s29 = scalar_lea.vmem %s674_s25, 128 }
  0x19   : > { %446 = vmatpush3.bf16.msra.mxu1 %v233_v9  ;;  %p505_p11 = scmp.ne.s32.totalorder %s674_s25, %s504_s29  ;;  %p511_p0 = scmp.lt.s32.totalorder %s674_s25, %s509_s4 }
  0x1a   : > { %v178_v8 = vrot.slane %v167_v7, %v177_v6  ;;  %p512_p1 = scmp.lt.s32.totalorder %s510_s5, %s504_s29 }
  0x1b   : > { %p506_p12 = pnand %p505_p11, %p631_p5 }
  0x1c   : > { %179 = vrot.lane.b32.xlu0 %v178_v8, %s569_s6  ;;  %448 = vmatmul.mubr.msk.bf16.vlgmr.msra.gmra.mxu1 %vm181_vm2, %v168_v10  ;;  %p513_p2 = por %p512_p1, %p511_p0 }
  0x1d   : > { %p507_p13 = pneg %p506_p12 }
  0x1f   : > { %p514_p3 = pnand %p513_p2, %p507_p13 }
  0x20   : > { %286 = vrot.lane.b32.xlu0 %v427_v13, %s571_s7 }
  0x8e   : > { %v180_v14 = vpop.permute.xlu0 %179 }
  0x8f   : > { %v187_v15 = vsel %vm185_vm1, %v180_v14, 0 }
  0x90   : > { %440 = vmatpush3.bf16.msra.mxu0 %v187_v15 }
  0x91   : > { %451 = vmatprep.subr.bf16.mxu0 %v567_v3 }
  0x92   : > { %v287_v17 = vpop.permute.xlu0 %286  ;;  %v339_v30 = vpop.permute.xlu1 %338 }
  0x93   : > { %v292_v18 = vsel %vm185_vm1, %v287_v17, 0  ;;  %442 = vmatmul.mubr.msk.bf16.vlgmr.msra.gmra.mxu0 %vm181_vm2, %v423_v16 }
  0x94   : > { %452 = vmatpush3.bf16.msra.mxu0 %v292_v18  ;;  %453 = vmatprep.mubr.msk.bf16.mxu0 %vm568_vm0, %v567_v3 }
  0x9b   : > { %454 = vmatmul.mubr.msk.bf16.vlgmr.msra.gmra.mxu0 %vm181_vm2, %v426_v19 }
  0xdc   : > { %v269_v20 = vpop.f32.mrf.mxu1 }
  0xde   : > { %v449_v21 = vpop.f32.mrf.mxu1 }
  0xe0   : > { %v272_v22 = vpop.f32.mrf.mxu1 }
  0xe2   : > { %v450_v23 = vpop.f32.mrf.mxu1 }
 0x153   : > { %v223_v24 = vpop.f32.mrf.mxu0 }
 0x154   : > { %v270_v28 = vadd.f32 %v269_v20, %v223_v24 }
 0x155   : > { %v443_v25 = vpop.f32.mrf.mxu0 }
 0x157   : > { %v226_v26 = vpop.f32.mrf.mxu0 }
 0x159   : > { %v444_v27 = vpop.f32.mrf.mxu0 }
 0x15b   : > { %v328_v29 = vpop.f32.mrf.mxu0 }
 0x15c   : > { %v334_v31 = vadd.f32 %v328_v29, %v270_v28 }
 0x15d   : > { %v455_v32 = vpop.f32.mrf.mxu0 }
 0x15e   : > { %v341_v33 = vadd.f32 %v339_v30, %v334_v31 }
 0x15f   : > { %v331_v34 = vpop.f32.mrf.mxu0 }
 0x160   : > { %343 = vst.msk [vmem:[%s161_s24] sm:$0xff] %vm342_vm3, %v341_v33 }
 0x161   : > { %v456_v35 = vpop.f32.mrf.mxu0 }
 0x162   : > { %517 = shalt.err (!%p514_p3)
}
 0x163   : > { %s518_s6 = scalar_lea.hbm %s672_s28, 128  ;;  %s522_s9 = scalar_lea.hbm %s716_s3, 256 }
 0x164   : > { %p519_p4 = scmp.ne.s32.totalorder %s672_s28, %s518_s6  ;;  %p523_p9 = scmp.lt.s32.totalorder %s672_s28, %s716_s3 }
 0x165   : > { %p524_p10 = scmp.lt.s32.totalorder %s522_s9, %s518_s6 }
 0x166   : > { %p520_p7 = pnand %p519_p4, %p631_p5 }
 0x167   : > { %p525_p11 = por %p524_p10, %p523_p9 }
 0x168   : > { %p521_p8 = pneg %p520_p7 }
 0x16a   : > { %p526_p12 = pnand %p525_p11, %p521_p8 }
 0x16c   : > { %529 = shalt.err (!%p526_p12)
}
 0x16d   : > { %457 = dma.vmem_to_hbm [thread:$0]  (%p631_p5), %s674_s25, 128, %s672_s28, %s345_s16  }
 0x16e PF: > { %p463_p13 = scmp.ge.s32.totalorder %s564_s15, 2  ;;  %s370_s17 = sand.u32 1, %s552_s12  }
 0x16f   : > { %s371_s19 = scalar_lea.sflag [#allocation3], %s370_s17 }
 0x170   : > { %p460_p0 = pnand %p463_p13, %p635_p6 }
 0x172   : > { %p461_p1 = pneg %p460_p0 }
 0x174   : > { %547 = dma.done.wait (%p461_p1), %s371_s19, 128  }
 0x175   : > { %549 = vsyncadd (%p461_p1), %s371_s19, 4294967168  ;;  %p13_p2 = scmp.ge.s32.totalorder %s618_s18, 4   ;;  %s719_s12 = smov %s556_s13 }
 0x176   : > { %s720_s13 = smov %s560_s14  ;;  %s721_s14 = smov %s629_s21 }
 0x177   : > { %s722_s15 = smov %s618_s18  ;;  %15 = sbr.rel (!%p13_p2) target bundleno = 3 (0x3), region = 69 }
 0x17c   :  { %376 = vsyncpa [#allocation3], 1 }
 0x17d   :  { %378 = vsyncpa [#allocation3 + $0x1], 1 }

</bundles_post_ra>
